<compile_context>
chip_gen: v7x
topology: tpu7x:2x2x1
jax: 0.10.0
libtpu: 0.0.40
codegen_flags: <defaults>
</compile_context>

<pallas_src>
from typing import Dict, Optional

import jax
import jax.numpy as jnp
from jax import lax
from jax.experimental import pallas as pl
from jax.experimental.pallas import tpu as pltpu


def _round_up(x: int, m: int) -> int:
    return ((x + m - 1) // m) * m


# Cap on the per-chunk (tb, V) one-hot intermediate; above this, fall back to
# the per-row copy path.
_ONEHOT_MAX_BYTES = 4 * 1024 * 1024


# ----------------------------------------------------------------------------
# Path A: one-hot MXU gather (small/medium vocab)
# ----------------------------------------------------------------------------
def _onehot_gather_kernel(idx_ref, table_ref, o_ref):
    # idx_ref  : (tb, 1) int32 global row ids (VMEM block)
    # table_ref: (V, D) concatenated embedding table, resident in VMEM
    # o_ref    : (tb, D) dense output block for this grid step
    tb = idx_ref.shape[0]
    v = table_ref.shape[0]
    ids = idx_ref[...]                                              # (tb, 1)
    onehot = (ids == lax.broadcasted_iota(jnp.int32, (tb, v), 1))   # (tb, V)
    onehot = onehot.astype(table_ref.dtype)
    # Exactly one 1.0 per row -> HIGHEST-precision f32 matmul reproduces the
    # gathered rows (within ~1 ulp).
    o_ref[...] = jnp.dot(
        onehot, table_ref[...],
        preferred_element_type=jnp.float32,
        precision=lax.Precision.HIGHEST,
    ).astype(o_ref.dtype)


def _gather_onehot(table, flat_idx, tb, n_pad):
    v, d = table.shape
    idx2d = flat_idx.reshape(n_pad, 1)
    return pl.pallas_call(
        _onehot_gather_kernel,
        out_shape=jax.ShapeDtypeStruct((n_pad, d), table.dtype),
        grid_spec=pltpu.PrefetchScalarGridSpec(
            num_scalar_prefetch=0,
            grid=(n_pad // tb,),
            in_specs=[
                pl.BlockSpec((tb, 1), lambda i: (i, 0)),
                # Full-extent table block with a constant block index ->
                # DMA'd into VMEM once, reused every grid step.
                pl.BlockSpec((v, d), lambda i: (0, 0)),
            ],
            out_specs=pl.BlockSpec((tb, d), lambda i: (i, 0)),
        ),
        compiler_params=pltpu.CompilerParams(
            dimension_semantics=("parallel",),
        ),
    )(idx2d, table)


# ----------------------------------------------------------------------------
# Path B: per-row copy fallback (large vocab)
# ----------------------------------------------------------------------------
def _make_rowcopy_kernel(block_rows: int):
    def kernel(idx_ref, table_ref, o_ref):
        # idx_ref  : scalar-prefetched int32[N_pad] global row ids (SMEM)
        # table_ref: (V, D) concatenated embedding table, resident in VMEM
        # o_ref    : (block_rows, D) dense output block
        base = pl.program_id(0) * block_rows
        # Statically unrolled: store offsets are static (dense block build);
        # only the table-row offset is dynamic.
        for r in range(block_rows):
            row = idx_ref[base + r]                      # scalar read from SMEM
            o_ref[pl.ds(r, 1), :] = table_ref[pl.ds(row, 1), :]

    return kernel


def _gather_rowcopy(table, flat_idx, tb, n_pad):
    v, d = table.shape
    return pl.pallas_call(
        _make_rowcopy_kernel(tb),
        out_shape=jax.ShapeDtypeStruct((n_pad, d), table.dtype),
        grid_spec=pltpu.PrefetchScalarGridSpec(
            num_scalar_prefetch=1,
            grid=(n_pad // tb,),
            in_specs=[pl.BlockSpec((v, d), lambda i, idx_ref: (0, 0))],
            out_specs=pl.BlockSpec((tb, d), lambda i, idx_ref: (i, 0)),
        ),
        compiler_params=pltpu.CompilerParams(
            dimension_semantics=("parallel",),
        ),
    )(flat_idx, table)


def embedding_gather(table: jnp.ndarray,
                     flat_idx: jnp.ndarray,
                     block_rows: int = 128) -> jnp.ndarray:
    """Gather rows of `table` (V, D) at `flat_idx` (N,) -> (N, D) via Pallas."""
    n = int(flat_idx.shape[0])
    v, d = table.shape
    flat_idx = jnp.clip(flat_idx.astype(jnp.int32), 0, v - 1)

    # Chunk size: multiple of 8 (f32 sublane tile), capped at `block_rows`.
    tb = min(block_rows, _round_up(max(n, 1), 8))
    n_pad = _round_up(max(n, 1), tb)
    if n_pad != n:
        pad = jnp.zeros((n_pad - n,), dtype=jnp.int32)   # padded ids hit row 0
        flat_idx = jnp.concatenate([flat_idx, pad], axis=0)

    # Pad the table's row count to a sublane multiple (ids were clamped to the
    # original V above, so padding rows are never selected).
    v_pad = _round_up(v, 8)
    if v_pad != v:
        table = jnp.concatenate(
            [table, jnp.zeros((v_pad - v, d), table.dtype)], axis=0)

    onehot_bytes = tb * v_pad * table.dtype.itemsize
    if onehot_bytes <= _ONEHOT_MAX_BYTES:
        out = _gather_onehot(table, flat_idx, tb, n_pad)
    else:
        out = _gather_rowcopy(table, flat_idx, tb, n_pad)
    return out[:n]


# ----------------------------------------------------------------------------
# EmbeddingLayer equivalent (parameters initialized deterministically in-script)
# ----------------------------------------------------------------------------
class EmbeddingLayerPallas:
    def __init__(self, enc_dict: Dict[str, Dict], embedding_dim: int, key) -> None:
        self.enc_dict = enc_dict
        self.embedding_dim = embedding_dim
        self.emb_feature = []
        self.offset_map = {}
        self.vocab_map = {}
        tables = []
        offset = 0
        i = 0
        for col in enc_dict.keys():
            if "vocab_size" in enc_dict[col].keys():
                self.emb_feature.append(col)
                vocab = enc_dict[col]["vocab_size"] + 1   # same +1 as nn.Embedding setup
                k = jax.random.fold_in(key, i)
                # nn.Embedding default init: N(0, 1)
                tables.append(jax.random.normal(k, (vocab, embedding_dim), jnp.float32))
                self.offset_map[col] = offset
                self.vocab_map[col] = vocab
                offset += vocab
                i += 1
        # One big concatenated table; per-feature rows addressed via offsets.
        self.table = jnp.concatenate(tables, axis=0)

    def _global_ids(self, raw: jnp.ndarray, col: str) -> jnp.ndarray:
        # Clamp per feature so a bad id cannot cross into another feature's rows.
        raw = jnp.clip(raw.astype(jnp.int32), 0, self.vocab_map[col] - 1)
        return raw + self.offset_map[col]

    def __call__(self, X: Dict[str, jnp.ndarray], name: Optional[str] = None) -> jnp.ndarray:
        if name is None:
            # torch: per feature view(-1,1) -> emb (B,1,D); stack dim=1; squeeze(2)
            # -> (B, F, D).
            idx_cols = [self._global_ids(X[col].reshape(-1), col)
                        for col in self.emb_feature]
            idx = jnp.stack(idx_cols, axis=1)                     # (B, F) global ids
            b, f = idx.shape
            out = embedding_gather(self.table, idx.reshape(-1))   # (B*F, D)
            return out.reshape(b, f, self.embedding_dim)
        else:
            if "seq" in name:
                col = name.replace("_seq", "")
                inp = X[name]
                shape = inp.shape                                 # (B, L)
                flat = self._global_ids(inp.reshape(-1), col)
                out = embedding_gather(self.table, flat)
                return out.reshape(*shape, self.embedding_dim)    # (B, L, D)
            else:
                inp = X[name].reshape(-1, 1)                      # (B, 1)
                b = inp.shape[0]
                flat = self._global_ids(inp.reshape(-1), name)
                out = embedding_gather(self.table, flat)
                return out.reshape(b, 1, self.embedding_dim)      # (B, 1, D)


# ----------------------------------------------------------------------------
# Demo / correctness check
# ----------------------------------------------------------------------------
if __name__ == "__main__":
    enc_dict = {
        "user_id": {"vocab_size": 100},
        "item_id": {"vocab_size": 50},
        "cate_id": {"vocab_size": 20},
        "price": {"min": 0.0, "max": 1.0},  # no vocab_size -> not embedded
    }
    embedding_dim = 32
    batch = 4

    key = jax.random.PRNGKey(0)
    model = EmbeddingLayerPallas(enc_dict, embedding_dim, key)

    k0, k1, k2, k3, k4 = jax.random.split(key, 5)
    X = {
        "user_id": jax.random.randint(k0, (batch,), 0, 101, dtype=jnp.int32),
        "item_id": jax.random.randint(k1, (batch,), 0, 51, dtype=jnp.int32),
        "cate_id": jax.random.randint(k2, (batch,), 0, 21, dtype=jnp.int32),
        "price": jax.random.uniform(k3, (batch,)),
        "item_id_seq": jax.random.randint(k4, (batch, 8), 0, 51, dtype=jnp.int32),
    }

    # Default forward path (name=None): (batch, num_emb_features, embedding_dim)
    out = model(X)
    out = jax.block_until_ready(out)
    assert out.shape == (batch, len(model.emb_feature), embedding_dim)

    # Pure-JAX reference for the gather
    ref_cols = []
    for col in model.emb_feature:
        rows = jnp.take(
            model.table, X[col].astype(jnp.int32) + model.offset_map[col], axis=0
        )
        ref_cols.append(rows)
    ref = jnp.stack(ref_cols, axis=1)
    assert jnp.allclose(out, ref, atol=1e-5), "mismatch vs reference"

    # Named / sequence path
    seq_out = model(X, name="item_id_seq")
    seq_out = jax.block_until_ready(seq_out)
    assert seq_out.shape == (batch, 8, embedding_dim)
    seq_ref = jnp.take(
        model.table,
        X["item_id_seq"].astype(jnp.int32) + model.offset_map["item_id"],
        axis=0,
    )
    assert jnp.allclose(seq_out, seq_ref, atol=1e-5), "seq mismatch vs reference"

    # Named / non-sequence path: (batch, 1, embedding_dim)
    one_out = model(X, name="item_id")
    one_out = jax.block_until_ready(one_out)
    assert one_out.shape == (batch, 1, embedding_dim)
    one_ref = jnp.take(
        model.table, X["item_id"].astype(jnp.int32) + model.offset_map["item_id"], axis=0
    )[:, None, :]
    assert jnp.allclose(one_out, one_ref, atol=1e-5), "named mismatch vs reference"

    print("KERNEL_OK")
</pallas_src>

<mosaic_0001>
module attributes {stable_mosaic.version = 11 : i64} {
  func.func @_onehot_gather_kernel(%arg0: i32, %arg1: memref<16x1xi32, #tpu.memory_space<vmem>>, %arg2: memref<176x32xf32, #tpu.memory_space<vmem>>, %arg3: memref<16x32xf32, #tpu.memory_space<vmem>>) attributes {dimension_semantics = [#tpu.dimension_semantics<parallel>], iteration_bounds = array<i64: 1>, scalar_prefetch = 0 : i64, scratch_operands = 0 : i64, tpu.core_type = #tpu.core_type<tc>, window_params = [{transform_indices = @transform_0, window_bounds = array<i64: 16, 1>}, {pipeline_mode = #tpu.pipeline_mode<synchronous>, transform_indices = @transform_1, window_bounds = array<i64: 176, 32>}, {transform_indices = @transform_2, window_bounds = array<i64: 16, 32>}]} {
    %c0 = arith.constant 0 : index
    %c0_0 = arith.constant 0 : index
    %0 = vector.load %arg1[%c0, %c0_0] : memref<16x1xi32, #tpu.memory_space<vmem>>, vector<16x1xi32>
    %1 = tpu.iota {dimensions = array<i32: 1>} : vector<16x176xi32>
    %2 = vector.broadcast %0 : vector<16x1xi32> to vector<16x176xi32>
    %3 = arith.cmpi eq, %2, %1 : vector<16x176xi32>
    %4 = arith.extui %3 : vector<16x176xi1> to vector<16x176xi32>
    %5 = arith.sitofp %4 : vector<16x176xi32> to vector<16x176xf32>
    %c0_1 = arith.constant 0 : index
    %c0_2 = arith.constant 0 : index
    %6 = vector.load %arg2[%c0_1, %c0_2] : memref<176x32xf32, #tpu.memory_space<vmem>>, vector<176x32xf32>
    %cst = arith.constant dense<0.000000e+00> : vector<16x32xf32>
    %7 = tpu.matmul %5, %6, %cst {dimension_numbers = #tpu.dot_dimension_numbers<[1], [0], [0], [1], [0, 0, 1, 1], [], []>, precision = #tpu.contract_precision<fp32>} : vector<16x176xf32>, vector<176x32xf32>, vector<16x32xf32> -> vector<16x32xf32>
    %c0_3 = arith.constant 0 : index
    %c0_4 = arith.constant 0 : index
    %8 = vector.load %arg3[%c0_3, %c0_4] : memref<16x32xf32, #tpu.memory_space<vmem>>, vector<16x32xf32>
    tpu.vector_store %arg3[%c0_3, %c0_4], %7 {strides = array<i32>} : memref<16x32xf32, #tpu.memory_space<vmem>>, vector<16x32xf32>,
    return
  }
  func.func @transform_0(%arg0: i32) -> (i32, i32) {
    %c0_i32 = arith.constant 0 : i32
    %c0_i32_0 = arith.constant 0 : i32
    return %arg0, %c0_i32 : i32, i32
  }
  func.func @transform_1(%arg0: i32) -> (i32, i32) {
    %c0_i32 = arith.constant 0 : i32
    %c0_i32_0 = arith.constant 0 : i32
    %c0_i32_1 = arith.constant 0 : i32
    return %c0_i32, %c0_i32_0 : i32, i32
  }
  func.func @transform_2(%arg0: i32) -> (i32, i32) {
    %c0_i32 = arith.constant 0 : i32
    %c0_i32_0 = arith.constant 0 : i32
    return %arg0, %c0_i32 : i32, i32
  }
}

</mosaic_0001>

<bundles_post_ra>
// kernel: tpu_custom_call.1
= control target key start
LH: loop header
LB: loop body
LE: loop exit
PB: predicated region body
PF: predicated region fallthrough
CT: control target
= control target key end

     0   :  { %v1135_v2 = vmov 0   ;;  %v1751_v3 = vmov 0.0|0.0   ;;  %s1740_s0 = inlined_call_operand.vmem [shape: s32[16,1], index: 0, kind: input, shape index: {}]   ;;  %s1741_s1 = inlined_call_operand.vmem [shape: f32[176,32], index: 1, kind: input, shape index: {}]   ;;  %s1742_s2 = inlined_call_operand.hbm [shape: f32[16,32], index: 2, kind: output, shape index: {}]  }
   0x1   :  { %v12_v0 = vld [vmem:[%s1740_s0] sm:$0xff]  ;;  %1110 = vset.pattern.permute.xlu0 %v1135_v2  ;;  %986 = vmatprep.subr.bf16.mxu0 %v1751_v3  ;;  %v36_v4 = vld [vmem:[%s1741_s1 + $0x8] sm:$0xff]  ;;  %v37_v6 = vld [vmem:[%s1741_s1 + $0x10] sm:$0xff] }
   0x2   :  { %v35_v1 = vld [vmem:[%s1741_s1] sm:$0xff]  ;;  %v38_v7 = vld [vmem:[%s1741_s1 + $0x18] sm:$0xff]  ;;  %18 = vperm.xlu0 %1110, %v12_v0   ;;  %v68_v8 = vand.u32 4294901760, %v36_v4  ;;  %887 = vmatprep.subr.bf16.mxu1 %v1751_v3  ;;  %v71_v9 = vand.u32 4294901760, %v37_v6  ;;  %v40_v12 = vld [vmem:[%s1741_s1 + $0x28] sm:$0xff] }
   0x3   :  { %v65_v5 = vand.u32 4294901760, %v35_v1  ;;  %v74_v10 = vand.u32 4294901760, %v38_v7  ;;  %v39_v11 = vld [vmem:[%s1741_s1 + $0x20] sm:$0xff]  ;;  %v1183_v13 = vld [vmem:[%s1741_s1 + $0x30] sm:$0xff]  ;;  %v13_v14 = vld [vmem:[%s1740_s0 + $0x8] sm:$0xff]  ;;  %v80_v17 = vand.u32 4294901760, %v40_v12 }
   0x4   :  { %v77_v16 = vand.u32 4294901760, %v39_v11  ;;  %v42_v18 = vld [vmem:[%s1741_s1 + $0x38] sm:$0xff]  ;;  %v43_v19 = vld [vmem:[%s1741_s1 + $0x40] sm:$0xff]  ;;  %v1198_v21 = vsub.f32 %v36_v4, %v68_v8  ;;  %v1200_v22 = vsub.f32 %v37_v6, %v71_v9  ;;  %v83_v23 = vand.u32 4294901760, %v1183_v13  ;;  %v44_v24 = vld [vmem:[%s1741_s1 + $0x48] sm:$0xff] }
   0x5   :  { %v1188_v15 = vsub.f32 %v35_v1, %v65_v5  ;;  %v1196_v20 = vpack.c.bf16 %v68_v8, %v65_v5  ;;  %v1209_v25 = vld [vmem:[%s1741_s1 + $0x50] sm:$0xff]  ;;  %v1214_v26 = vld [vmem:[%s1741_s1 + $0x58] sm:$0xff]  ;;  %v1216_v27 = vsub.f32 %v38_v7, %v74_v10  ;;  %v1220_v29 = vsub.f32 %v40_v12, %v80_v17  ;;  %v1225_v30 = vld [vmem:[%s1741_s1 + $0x60] sm:$0xff] }
   0x6   :  { %v1218_v28 = vsub.f32 %v39_v11, %v77_v16  ;;  %v1230_v31 = vld [vmem:[%s1741_s1 + $0x68] sm:$0xff]  ;;  %21 = vperm.xlu0 %1110, %v13_v14   ;;  %v1233_v32 = vpack.c.bf16 %v74_v10, %v71_v9  ;;  %v86_v33 = vand.u32 4294901760, %v42_v18  ;;  %v1236_v34 = vsub.f32 %v1183_v13, %v83_v23  ;;  %v1245_v39 = vld [vmem:[%s1741_s1 + $0x70] sm:$0xff]  ;;  %v1257_v44 = vld [vmem:[%s1741_s1 + $0x78] sm:$0xff] }
   0x7   :  { %988 = vmatpush1.bf16.msra.mxu0 %v1196_v20  ;;  %v89_v35 = vand.u32 4294901760, %v43_v19  ;;  %889 = vmatpush1.bf16.msra.mxu1 %v1196_v20  ;;  %v92_v36 = vand.u32 4294901760, %v44_v24  ;;  %v95_v37 = vand.u32 4294901760, %v1209_v25  ;;  %v98_v38 = vand.u32 4294901760, %v1214_v26  ;;  %v1262_v45 = vld [vmem:[%s1741_s1 + $0x80] sm:$0xff] }
   0x8   :  { %989 = vmatprep.subr.bf16.mxu0 %v1751_v3  ;;  %890 = vmatprep.subr.bf16.mxu1 %v1751_v3  ;;  %v1248_v40 = vsub.f32 %v42_v18, %v86_v33  ;;  %v101_v42 = vand.u32 4294901760, %v1225_v30  ;;  %v104_v43 = vand.u32 4294901760, %v1230_v31 }
   0x9   :  { %v1250_v41 = vsub.f32 %v43_v19, %v89_v35 }
   0xa   :  { %7 = vsyncpa [#allocation3], 0  ;;  %v1264_v46 = vsub.f32 %v44_v24, %v92_v36  ;;  %v1267_v47 = vsub.f32 %v1209_v25, %v95_v37  ;;  %v1270_v48 = vsub.f32 %v1214_v26, %v98_v38  ;;  %v1275_v49 = vld [vmem:[%s1741_s1 + $0x88] sm:$0xff]  ;;  %v1280_v50 = vld [vmem:[%s1741_s1 + $0x90] sm:$0xff]  ;;  %v1283_v51 = vpack.c.bf16 %v80_v17, %v77_v16 }
   0xb   :  { %991 = vmatpush1.bf16.msra.mxu0 %v1233_v32  ;;  %v1288_v52 = vsub.f32 %v1225_v30, %v101_v42  ;;  %v1293_v53 = vsub.f32 %v1230_v31, %v104_v43  ;;  %v107_v54 = vand.u32 4294901760, %v1245_v39  ;;  %v1299_v55 = vld [vmem:[%s1741_s1 + $0x98] sm:$0xff]  ;;  %892 = vmatpush1.bf16.msra.mxu1 %v1233_v32  ;;  %v110_v56 = vand.u32 4294901760, %v1257_v44  ;;  %v1316_v61 = vld [vmem:[%s1741_s1 + $0xa0] sm:$0xff]  ;;  %v1321_v62 = vld [vmem:[%s1741_s1 + $0xa8] sm:$0xff]  ;;  %s1139_s1 = smov [#allocation2]  }
   0xc   :  { %992 = vmatprep.subr.bf16.mxu0 %v1751_v3  ;;  %v1748_v57 = vand.u32 4294901760, %v1262_v45  ;;  %893 = vmatprep.subr.bf16.mxu1 %v1751_v3  ;;  %v1747_v59 = vand.u32 4294901760, %v1275_v49  ;;  %v1746_v60 = vand.u32 4294901760, %v1280_v50  ;;  %v1745_v1 = vand.u32 4294901760, %v1299_v55  ;;  %s860_s28 = sshll.u32 %s1139_s1, 4  ;;  %s861_s28 = int_to_ptr.vmem [resolvable:$true] %s860_s28 }
   0xd   :  { %v1309_v58 = vsub.f32 %v1245_v39, %v107_v54  ;;  %v1326_v63 = vsub.f32 %v1257_v44, %v110_v56  ;;  %v1335_v2 = vpack.c.bf16 %v86_v33, %v83_v23  ;;  %v1337_v4 = vpack.c.bf16 %v92_v36, %v89_v35  ;;  %s1111_s29 = scalar_lea.vmem %s861_s28, 256  ;;  %p1116_p1 = scmp.lt.s32.totalorder %s861_s28, %s861_s28 }
   0xe   :  { %v1331_v0 = vsub.f32 %v1262_v45, %v1748_v57  ;;  %v1342_v5 = vsub.f32 %v1275_v49, %v1747_v59  ;;  %v1347_v6 = vsub.f32 %v1280_v50, %v1746_v60  ;;  %v1354_v7 = vsub.f32 %v1299_v55, %v1745_v1  ;;  %p1112_p0 = scmp.ne.s32.totalorder %s861_s28, %s1111_s29  ;;  %p1117_p2 = scmp.lt.s32.totalorder %s1111_s29, %s1111_s29 }
   0xf   :  { %1762 = vst [vmem:[#allocation5_spill] sm:$0xff] %v1309_v58  ;;  %1763 = vst [vmem:[#allocation6_spill] sm:$0xff] %v1326_v63  ;;  %994 = vmatpush1.bf16.msra.mxu0 %v1283_v51  ;;  %895 = vmatpush1.bf16.msra.mxu1 %v1283_v51  ;;  %v1744_v8 = vand.u32 4294901760, %v1316_v61  ;;  %v1743_v9 = vand.u32 4294901760, %v1321_v62  ;;  %v184_v10 = vand.u32 4294901760, %v1188_v15  ;;  %v191_v11 = vand.u32 4294901760, %v1198_v21 }
  0x10   :  { %1764 = vst [vmem:[#allocation7_spill] sm:$0xff] %v1331_v0  ;;  %1765 = vst [vmem:[#allocation8_spill] sm:$0xff] %v1342_v5  ;;  %995 = vmatprep.subr.bf16.mxu0 %v1751_v3  ;;  %896 = vmatprep.subr.bf16.mxu1 %v1751_v3  ;;  %v198_v12 = vand.u32 4294901760, %v1200_v22  ;;  %v205_v13 = vand.u32 4294901760, %v1216_v27  ;;  %v212_v14 = vand.u32 4294901760, %v1218_v28  ;;  %v1364_v16 = vpack.c.bf16 %v98_v38, %v95_v37  ;;  %p1118_p3 = por %p1117_p2, %p1116_p1 }
  0x11   :  { %1766 = vst [vmem:[#allocation9_spill] sm:$0xff] %v1347_v6  ;;  %1767 = vst [vmem:[#allocation10_spill] sm:$0xff] %v1354_v7  ;;  %v1369_v17 = vsub.f32 %v1316_v61, %v1744_v8  ;;  %v1374_v18 = vsub.f32 %v1321_v62, %v1743_v9  ;;  %v185_v19 = vsub.f32 %v1188_v15, %v184_v10  ;;  %v219_v36 = vand.u32 4294901760, %v1220_v29 }
  0x12   :  { %v1378_v23 = vpack.c.bf16 %v191_v11, %v184_v10  ;;  %v192_v24 = vsub.f32 %v1198_v21, %v191_v11  ;;  %v1381_v25 = vpack.c.bf16 %v205_v13, %v198_v12  ;;  %v199_v26 = vsub.f32 %v1200_v22, %v198_v12  ;;  %p1119_p4 = pnand %p1118_p3, %p1112_p0 }
  0x13   :  { %1768 = vst [vmem:[#allocation11_spill] sm:$0xff] %v1369_v17  ;;  %1769 = vst [vmem:[#allocation12_spill] sm:$0xff] %v1374_v18  ;;  %997 = vmatpush1.bf16.msra.mxu0 %v1335_v2  ;;  %898 = vmatpush1.bf16.msra.mxu1 %v1335_v2  ;;  %v186_v33 = vand.u32 4294901760, %v185_v19  ;;  %v206_v35 = vsub.f32 %v1216_v27, %v205_v13  ;;  %v213_v37 = vsub.f32 %v1218_v28, %v212_v14  ;;  %vm57_vm0 = vcmask 392192  }
  0x14   :  { %998 = vmatprep.subr.bf16.mxu0 %v1751_v3  ;;  %899 = vmatprep.subr.bf16.mxu1 %v1751_v3  ;;  %v193_v38 = vand.u32 4294901760, %v192_v24  ;;  %v200_v10 = vand.u32 4294901760, %v199_v26  ;;  %v226_v11 = vand.u32 4294901760, %v1236_v34  ;;  %v233_v9 = vand.u32 4294901760, %v1248_v40 }
  0x15   :  { %v207_v12 = vand.u32 4294901760, %v206_v35  ;;  %v1392_v8 = vpack.c.bf16 %v219_v36, %v212_v14  ;;  %v214_v1 = vand.u32 4294901760, %v213_v37  ;;  %v220_v19 = vsub.f32 %v1220_v29, %v219_v36 }
  0x16   :  { %v1396_v13 = vpack.c.bf16 %v193_v38, %v186_v33  ;;  %v1398_v60 = vpack.c.bf16 %v233_v9, %v226_v11  ;;  %v227_v59 = vsub.f32 %v1236_v34, %v226_v11  ;;  %v234_v24 = vsub.f32 %v1248_v40, %v233_v9 }
  0x17   :  { %1000 = vmatpush1.bf16.msra.mxu0 %v1337_v4  ;;  %901 = vmatpush1.bf16.msra.mxu1 %v1337_v4  ;;  %v1404_v26 = vpack.c.bf16 %v207_v12, %v200_v10  ;;  %v221_v14 = vand.u32 4294901760, %v220_v19  ;;  %v240_v35 = vand.u32 4294901760, %v1250_v41  ;;  %v247_v36 = vand.u32 4294901760, %v1264_v46 }
  0x18   :  { %1001 = vmatprep.subr.bf16.mxu0 %v1751_v3  ;;  %902 = vmatprep.subr.bf16.mxu1 %v1751_v3  ;;  %v228_v33 = vand.u32 4294901760, %v227_v59  ;;  %v235_v37 = vand.u32 4294901760, %v234_v24  ;;  %v1420_v10 = vpack.c.bf16 %v104_v43, %v101_v42  ;;  %v254_v19 = vand.u32 4294901760, %v1267_v47 }
  0x19   :  { %v1409_v38 = vpack.c.bf16 %v221_v14, %v214_v1  ;;  %v1411_v11 = vpack.c.bf16 %v247_v36, %v240_v35  ;;  %v241_v9 = vsub.f32 %v1250_v41, %v240_v35  ;;  %v248_v57 = vsub.f32 %v1264_v46, %v247_v36 }
  0x1a   :  { %v1422_v12 = vpack.c.bf16 %v235_v37, %v228_v33  ;;  %v261_v24 = vand.u32 4294901760, %v1270_v48  ;;  %v255_v31 = vsub.f32 %v1267_v47, %v254_v19  ;;  %v1440_v43 = vpack.c.bf16 %v110_v56, %v107_v54 }
  0x1b   :  { %1003 = vmatpush1.bf16.msra.mxu0 %v1364_v16  ;;  %904 = vmatpush1.bf16.msra.mxu1 %v1364_v16  ;;  %v242_v59 = vand.u32 4294901760, %v241_v9  ;;  %v249_v1 = vand.u32 4294901760, %v248_v57  ;;  %v268_v36 = vand.u32 4294901760, %v1288_v52  ;;  %v275_v33 = vand.u32 4294901760, %v1293_v53 }
  0x1c   :  { %1004 = vmatprep.subr.bf16.mxu0 %v1751_v3  ;;  %905 = vmatprep.subr.bf16.mxu1 %v1751_v3  ;;  %v1431_v30 = vpack.c.bf16 %v261_v24, %v254_v19  ;;  %v262_v42 = vsub.f32 %v1270_v48, %v261_v24  ;;  %v256_v57 = vand.u32 4294901760, %v255_v31  ;;  %v1770_v54 = vand.u32 4294901760, %v1262_v45 }
  0x1d   :  { %v1429_v14 = vpack.c.bf16 %v249_v1, %v242_v59  ;;  %v1449_v9 = vpack.c.bf16 %v275_v33, %v268_v36  ;;  %v269_v39 = vsub.f32 %v1288_v52, %v268_v36  ;;  %v276_v44 = vsub.f32 %v1293_v53, %v275_v33 }
  0x1e   :  { %v263_v35 = vand.u32 4294901760, %v262_v42  ;;  %v1771_v56 = vand.u32 4294901760, %v1275_v49  ;;  %v282_v24 = vand.u32 4294901760, %v1309_v58  ;;  %v289_v31 = vand.u32 4294901760, %v1326_v63 }
  0x1f   :  { %1006 = vmatpush1.bf16.msra.mxu0 %v1420_v10  ;;  %907 = vmatpush1.bf16.msra.mxu1 %v1420_v10  ;;  %v270_v1 = vand.u32 4294901760, %v269_v39  ;;  %v277_v19 = vand.u32 4294901760, %v276_v44  ;;  %v1774_v36 = vand.u32 4294901760, %v1299_v55  ;;  %vm852_vm5 = vcmask 261120  }
  0x20   :  { %1007 = vmatprep.subr.bf16.mxu0 %v1751_v3  ;;  %908 = vmatprep.subr.bf16.mxu1 %v1751_v3  ;;  %v1447_v37 = vpack.c.bf16 %v263_v35, %v256_v57  ;;  %v1458_v59 = vpack.c.bf16 %v1771_v56, %v1770_v54  ;;  %v1467_v57 = vpack.c.bf16 %v289_v31, %v282_v24  ;;  %v1773_v35 = vand.u32 4294901760, %v1280_v50 }
  0x21   :  { %v1465_v42 = vpack.c.bf16 %v277_v19, %v270_v1  ;;  %v283_v45 = vsub.f32 %v1309_v58, %v282_v24  ;;  %v290_v49 = vsub.f32 %v1326_v63, %v289_v31  ;;  %v296_v54 = vand.u32 4294901760, %v1331_v0 }
  0x22   :  { %1772 = vst [vmem:[#allocation13_spill] sm:$0xff] %v1458_v59  ;;  %v1476_v33 = vpack.c.bf16 %v1774_v36, %v1773_v35  ;;  %v303_v56 = vand.u32 4294901760, %v1342_v5  ;;  %v1776_v24 = vand.u32 4294901760, %v1316_v61  ;;  %v1777_v31 = vand.u32 4294901760, %v1321_v62 }
  0x23   :  { %1009 = vmatpush1.bf16.msra.mxu0 %v1440_v43  ;;  %910 = vmatpush1.bf16.msra.mxu1 %v1440_v43  ;;  %v284_v39 = vand.u32 4294901760, %v283_v45  ;;  %v291_v44 = vand.u32 4294901760, %v290_v49  ;;  %v297_v50 = vsub.f32 %v1331_v0, %v296_v54  ;;  %v310_v36 = vand.u32 4294901760, %v1347_v6 }
  0x24   :  { %1010 = vmatprep.subr.bf16.mxu0 %v1751_v3  ;;  %911 = vmatprep.subr.bf16.mxu1 %v1751_v3  ;;  %1775 = vst [vmem:[#allocation14_spill] sm:$0xff] %v1476_v33  ;;  %v1485_v19 = vpack.c.bf16 %v303_v56, %v296_v54  ;;  %v304_v55 = vsub.f32 %v1342_v5, %v303_v56  ;;  %v1779_v58 = vmov 0.0|0.0  }
  0x25   :  { %v1483_v1 = vpack.c.bf16 %v291_v44, %v284_v39  ;;  %v1494_v45 = vpack.c.bf16 %v1777_v31, %v1776_v24  ;;  %v298_v49 = vand.u32 4294901760, %v297_v50  ;;  %v317_v39 = vand.u32 4294901760, %v1354_v7 }
  0x26   :  { %v305_v35 = vand.u32 4294901760, %v304_v55  ;;  %v311_v61 = vsub.f32 %v1347_v6, %v310_v36  ;;  %v324_v55 = vand.u32 4294901760, %v1369_v17  ;;  %v331_v24 = vand.u32 4294901760, %v1374_v18 }
  0x27   :  { %1012 = vmatpush1.bf16.msra.mxu0 %v1458_v59  ;;  %913 = vmatpush1.bf16.msra.mxu1 %v1458_v59  ;;  %1778 = vst [vmem:[#allocation15_spill] sm:$0xff] %v1494_v45  ;;  %v1503_v54 = vpack.c.bf16 %v317_v39, %v310_v36  ;;  %v318_v62 = vsub.f32 %v1354_v7, %v317_v39 }
  0x28   :  { %1013 = vmatprep.subr.bf16.mxu0 %v1751_v3  ;;  %914 = vmatprep.subr.bf16.mxu1 %v1751_v3  ;;  %v1501_v44 = vpack.c.bf16 %v305_v35, %v298_v49  ;;  %v312_v56 = vand.u32 4294901760, %v311_v61  ;;  %v1515_v49 = vpack.c.bf16 %v331_v24, %v324_v55  ;;  %v325_v35 = vsub.f32 %v1369_v17, %v324_v55 }
  0x29   :  { %v319_v50 = vand.u32 4294901760, %v318_v62  ;;  %v332_v36 = vsub.f32 %v1374_v18, %v331_v24 }
  0x2a   :  { %v326_v39 = vand.u32 4294901760, %v325_v35 }
  0x2b   :  { %1015 = vmatpush1.bf16.msra.mxu0 %v1476_v33  ;;  %916 = vmatpush1.bf16.msra.mxu1 %v1476_v33  ;;  %v1513_v31 = vpack.c.bf16 %v319_v50, %v312_v56  ;;  %v333_v33 = vand.u32 4294901760, %v332_v36  ;;  %v14_v56 = vlaneseq  ;;  %v1137_v36 = vmov 0.0  }
  0x2c   :  { %1016 = vmatprep.subr.bf16.mxu0 %v1751_v3  ;;  %917 = vmatprep.subr.bf16.mxu1 %v1751_v3 }
  0x2d   :  { %v1519_v59 = vpack.c.bf16 %v333_v33, %v326_v39  ;;  %v1543_v55 = vand.u32 127, %v14_v56 }
  0x2f   :  { %1018 = vmatpush1.bf16.msra.mxu0 %v1494_v45  ;;  %919 = vmatpush1.bf16.msra.mxu1 %v1494_v45  ;;  %v16_v24 = vadd.s32 128, %v1543_v55 }
  0x30   :  { %1019 = vmatprep.subr.bf16.mxu0 %v1751_v3  ;;  %920 = vmatprep.subr.bf16.mxu1 %v1751_v3 }
  0x81   :  { %v1546_v62 = vpop.permute.xlu0 %18 }
  0x82   :  { %vm23_vm1 = vcmp.eq.s32.totalorder %v1546_v62, %v1543_v55  ;;  %vm24_vm2 = vcmp.eq.s32.totalorder %v1546_v62, %v16_v24 }
  0x83   :  { %v871_v39 = vsel %vm23_vm1, 1.0, %v1137_v36  ;;  %v1554_v35 = vsel %vm24_vm2, 1.0, %v1137_v36 }
  0x84   :  { %v1556_v50 = vsub.f32 %v871_v39, %v871_v39  ;;  %v59_v56 = vsel %vm57_vm0, %v1554_v35, 0 }
  0x85   :  { %v1560_v33 = vpop.permute.xlu0 %21  ;;  %v1562_v61 = vsub.f32 %v59_v56, %v59_v56 }
  0x86   :  { %vm25_vm3 = vcmp.eq.s32.totalorder %v1560_v33, %v1543_v55  ;;  %vm26_vm4 = vcmp.eq.s32.totalorder %v1560_v33, %v16_v24  ;;  %v158_v3 = vand.u32 4294901760, %v1556_v50 }
  0x87   :  { %v873_v17 = vsel %vm25_vm3, 1.0, %v1137_v36  ;;  %v1571_v39 = vsel %vm26_vm4, 1.0, %v1137_v36  ;;  %v152_v18 = vand.u32 4294901760, %v1562_v61 }
  0x88   :  { %v62_v45 = vsel %vm57_vm0, %v1571_v39, 0  ;;  %v1576_v56 = vsub.f32 %v873_v17, %v873_v17  ;;  %v159_v6 = vsub.f32 %v1556_v50, %v158_v3 }
  0x89   :  { %v1579_v7 = vsub.f32 %v62_v45, %v62_v45  ;;  %586 = vmatprep.mubr.f32.mxu0 %v152_v18  ;;  %v153_v24 = vsub.f32 %v1562_v61, %v152_v18 }
  0x8a   :  { %590 = vmatmul.mubr.f32.vlgmr.msra.gmra.mrb[0].mxu0 %v158_v3  ;;  %v173_v0 = vand.u32 4294901760, %v1576_v56  ;;  %v160_v63 = vand.u32 4294901760, %v159_v6 }
  0x8b   :  { %1021 = vmatpush1.bf16.msra.mxu0 %v1378_v23  ;;  %v154_v36 = vand.u32 4294901760, %v153_v24  ;;  %v167_v5 = vand.u32 4294901760, %v1579_v7 }
  0x8c   :  { %1022 = vmatprep.subr.bf16.mxu0 %v1779_v58  ;;  %v174_v17 = vsub.f32 %v1576_v56, %v173_v0 }
  0x8d   :  { %155 = vmatprep.mubr.f32.mxu1 %v154_v36  ;;  %597 = vmatprep.mubr.f32.mxu0 %v167_v5  ;;  %v168_v45 = vsub.f32 %v1579_v7, %v167_v5 }
  0x8e   :  { %161 = vmatmul.mubr.f32.vlgmr.msra.gmra.mrb[0].mxu1 %v160_v63  ;;  %601 = vmatmul.mubr.f32.gmra.mrb[2].mxu0 %v173_v0  ;;  %v175_v18 = vand.u32 4294901760, %v174_v17  ;;  %v1780_v63 = vpack.c.bf16 %v1198_v21, %v1188_v15  ;;  %v1782_v15 = vpack.c.bf16 %v1220_v29, %v1218_v28  ;;  %v1783_v21 = vpack.c.bf16 %v1248_v40, %v1236_v34  ;;  %v1787_v29 = vld [vmem:[#allocation6_spill] sm:$0xff]  ;;  %v1790_v40 = vld [vmem:[#allocation13_spill] sm:$0xff]  ;;  %v1798_v0 = vld [vmem:[#allocation15_spill] sm:$0xff] }
  0x8f   :  { %922 = vmatpush1.bf16.msra.mxu1 %v1396_v13  ;;  %1024 = vmatpush1.bf16.msra.mxu0 %v1381_v25  ;;  %v169_v3 = vand.u32 4294901760, %v168_v45  ;;  %v1786_v28 = vpack.c.bf16 %v1293_v53, %v1288_v52  ;;  %v1796_v52 = vld [vmem:[#allocation9_spill] sm:$0xff] }
  0x90   :  { %879 = vmatprep.mubr.msk.f32.mxu0 %vm57_vm0, %v1554_v35  ;;  %923 = vmatprep.subr.bf16.mxu1 %v1779_v58 }
  0x91   :  { %170 = vmatprep.mubr.f32.mxu1 %v169_v3  ;;  %1025 = vmatprep.subr.bf16.mxu0 %v1779_v58 }
  0x92   :  { %176 = vmatmul.mubr.f32.gmra.mrb[2].mxu1 %v175_v18 }
  0x93   :  { %925 = vmatpush1.bf16.msra.mxu1 %v1404_v26  ;;  %1027 = vmatpush1.bf16.msra.mxu0 %v1392_v8 }
  0x94   :  { %875 = vmatprep.mubr.msk.f32.mxu1 %vm57_vm0, %v1554_v35  ;;  %926 = vmatprep.subr.bf16.mxu1 %v1779_v58 }
  0x95   :  { %1028 = vmatprep.subr.bf16.mxu0 %v1779_v58 }
  0x97   :  { %928 = vmatpush1.bf16.msra.mxu1 %v1409_v38  ;;  %1030 = vmatpush1.bf16.msra.mxu0 %v1398_v60  ;;  %v1138_v60 = vmov 1.0  }
  0x98   :  { %929 = vmatprep.subr.bf16.mxu1 %v1779_v58  ;;  %1031 = vmatprep.subr.bf16.mxu0 %v1779_v58 }
  0x9b   :  { %931 = vmatpush1.bf16.msra.mxu1 %v1422_v12  ;;  %1033 = vmatpush1.bf16.msra.mxu0 %v1411_v11 }
  0x9c   :  { %932 = vmatprep.subr.bf16.mxu1 %v1779_v58  ;;  %1034 = vmatprep.subr.bf16.mxu0 %v1779_v58 }
  0x9f   :  { %934 = vmatpush1.bf16.msra.mxu1 %v1429_v14  ;;  %1036 = vmatpush1.bf16.msra.mxu0 %v1431_v30 }
  0xa0   :  { %935 = vmatprep.subr.bf16.mxu1 %v1779_v58  ;;  %1037 = vmatprep.subr.bf16.mxu0 %v1779_v58 }
  0xa3   :  { %937 = vmatpush1.bf16.msra.mxu1 %v1447_v37  ;;  %1039 = vmatpush1.bf16.msra.mxu0 %v1449_v9 }
  0xa4   :  { %938 = vmatprep.subr.bf16.mxu1 %v1779_v58  ;;  %1040 = vmatprep.subr.bf16.mxu0 %v1779_v58 }
  0xa7   :  { %940 = vmatpush1.bf16.msra.mxu1 %v1465_v42  ;;  %1042 = vmatpush1.bf16.msra.mxu0 %v1467_v57 }
  0xa8   :  { %941 = vmatprep.subr.bf16.mxu1 %v1779_v58  ;;  %1043 = vmatprep.subr.bf16.mxu0 %v1779_v58 }
  0xab   :  { %943 = vmatpush1.bf16.msra.mxu1 %v1483_v1  ;;  %1045 = vmatpush1.bf16.msra.mxu0 %v1485_v19 }
  0xac   :  { %944 = vmatprep.subr.bf16.mxu1 %v1779_v58  ;;  %1046 = vmatprep.subr.bf16.mxu0 %v1779_v58 }
  0xaf   :  { %946 = vmatpush1.bf16.msra.mxu1 %v1501_v44  ;;  %1048 = vmatpush1.bf16.msra.mxu0 %v1503_v54 }
  0xb0   :  { %947 = vmatprep.subr.bf16.mxu1 %v1779_v58  ;;  %1049 = vmatprep.subr.bf16.mxu0 %v1779_v58 }
  0xb3   :  { %949 = vmatpush1.bf16.msra.mxu1 %v1513_v31  ;;  %1051 = vmatpush1.bf16.msra.mxu0 %v1515_v49 }
  0xb4   :  { %950 = vmatprep.subr.bf16.mxu1 %v1779_v58  ;;  %1052 = vmatprep.subr.bf16.mxu0 %v1779_v58 }
  0xb6   :  { %880 = vmatmul.mubr.msk.f32.vlgmr.msra.gmra.mrb[0].mxu0 %vm23_vm1, %v1138_v60 }
  0xb7   :  { %952 = vmatpush1.bf16.msra.mxu1 %v1519_v59  ;;  %881 = vmatprep.mubr.msk.f32.mxu0 %vm57_vm0, %v1571_v39 }
  0xb8   :  { %1054 = vmatpush1.bf16.msra.mxu0 %v1196_v20  ;;  %953 = vmatprep.subr.bf16.mxu1 %v1779_v58  ;;  %v1781_v20 = vpack.c.bf16 %v1216_v27, %v1200_v22  ;;  %v1784_v22 = vpack.c.bf16 %v1264_v46, %v1250_v41  ;;  %v1785_v27 = vpack.c.bf16 %v1270_v48, %v1267_v47  ;;  %v1791_v41 = vld [vmem:[#allocation8_spill] sm:$0xff]  ;;  %v1792_v46 = vld [vmem:[#allocation7_spill] sm:$0xff]  ;;  %v1794_v48 = vld [vmem:[#allocation14_spill] sm:$0xff] }
  0xb9   :  { %1055 = vmatprep.subr.bf16.mxu0 %v1779_v58  ;;  %v1793_v47 = vpack.c.bf16 %v1791_v41, %v1792_v46 }
  0xba   :  { %876 = vmatmul.mubr.msk.f32.vlgmr.msra.gmra.mrb[0].mxu1 %vm23_vm1, %v1138_v60  ;;  %882 = vmatmul.mubr.msk.f32.gmra.mrb[2].mxu0 %vm25_vm3, %v1138_v60 }
  0xbb   :  { %877 = vmatprep.mubr.msk.f32.mxu1 %vm57_vm0, %v1571_v39  ;;  %955 = vmatpush1.bf16.msra.mxu1 %v1780_v63 }
  0xbc   :  { %1057 = vmatpush1.bf16.msra.mxu0 %v1233_v32  ;;  %883 = vmatprep.mubr.msk.f32.mxu0 %vm57_vm0, %v1554_v35  ;;  %v1788_v32 = vld [vmem:[#allocation5_spill] sm:$0xff] }
  0xbd   :  { %956 = vmatprep.subr.bf16.mxu1 %v1779_v58  ;;  %1058 = vmatprep.subr.bf16.mxu0 %v1779_v58  ;;  %v1789_v34 = vpack.c.bf16 %v1787_v29, %v1788_v32 }
  0xbe   :  { %878 = vmatmul.mubr.msk.f32.gmra.mrb[2].mxu1 %vm25_vm3, %v1138_v60 }
  0xbf   :  { %958 = vmatpush1.bf16.msra.mxu1 %v1781_v20  ;;  %480 = vmatprep.mubr.f32.mxu1 %v1562_v61 }
  0xc0   :  { %1060 = vmatpush1.bf16.msra.mxu0 %v1283_v51  ;;  %959 = vmatprep.subr.bf16.mxu1 %v1779_v58  ;;  %v1795_v51 = vld [vmem:[#allocation10_spill] sm:$0xff] }
  0xc1   :  { %1061 = vmatprep.subr.bf16.mxu0 %v1779_v58  ;;  %v1797_v53 = vpack.c.bf16 %v1795_v51, %v1796_v52 }
  0xc3   :  { %961 = vmatpush1.bf16.msra.mxu1 %v1782_v15 }
  0xc4   :  { %1063 = vmatpush1.bf16.msra.mxu0 %v1335_v2  ;;  %962 = vmatprep.subr.bf16.mxu1 %v1779_v58  ;;  %v1799_v2 = vld [vmem:[#allocation12_spill] sm:$0xff] }
  0xc5   :  { %1064 = vmatprep.subr.bf16.mxu0 %v1779_v58 }
  0xc7   :  { %964 = vmatpush1.bf16.msra.mxu1 %v1783_v21 }
  0xc8   :  { %1066 = vmatpush1.bf16.msra.mxu0 %v1337_v4  ;;  %965 = vmatprep.subr.bf16.mxu1 %v1779_v58  ;;  %v1800_v4 = vld [vmem:[#allocation11_spill] sm:$0xff] }
  0xc9   :  { %1067 = vmatprep.subr.bf16.mxu0 %v1779_v58  ;;  %v1801_v5 = vpack.c.bf16 %v1799_v2, %v1800_v4 }
  0xcb   :  { %967 = vmatpush1.bf16.msra.mxu1 %v1784_v22 }
  0xcc   :  { %1069 = vmatpush1.bf16.msra.mxu0 %v1364_v16  ;;  %968 = vmatprep.subr.bf16.mxu1 %v1779_v58 }
  0xcd   :  { %1070 = vmatprep.subr.bf16.mxu0 %v1779_v58 }
  0xcf   :  { %970 = vmatpush1.bf16.msra.mxu1 %v1785_v27 }
  0xd0   :  { %1072 = vmatpush1.bf16.msra.mxu0 %v1420_v10  ;;  %971 = vmatprep.subr.bf16.mxu1 %v1779_v58 }
  0xd1   :  { %1073 = vmatprep.subr.bf16.mxu0 %v1779_v58 }
  0xd3   :  { %973 = vmatpush1.bf16.msra.mxu1 %v1786_v28 }
  0xd4   :  { %1075 = vmatpush1.bf16.msra.mxu0 %v1440_v43  ;;  %974 = vmatprep.subr.bf16.mxu1 %v1779_v58 }
  0xd5   :  { %1076 = vmatprep.subr.bf16.mxu0 %v1779_v58 }
  0xd7   :  { %976 = vmatpush1.bf16.msra.mxu1 %v1789_v34 }
  0xd8   :  { %1078 = vmatpush1.bf16.msra.mxu0 %v1790_v40  ;;  %977 = vmatprep.subr.bf16.mxu1 %v1779_v58 }
  0xd9   :  { %1079 = vmatprep.subr.bf16.mxu0 %v1779_v58 }
  0xdb   :  { %979 = vmatpush1.bf16.msra.mxu1 %v1793_v47 }
  0xdc   :  { %1081 = vmatpush1.bf16.msra.mxu0 %v1794_v48  ;;  %980 = vmatprep.subr.bf16.mxu1 %v1779_v58 }
  0xdd   :  { %1082 = vmatprep.subr.bf16.mxu0 %v1779_v58 }
  0xdf   :  { %982 = vmatpush1.bf16.msra.mxu1 %v1797_v53 }
  0xe0   :  { %1084 = vmatpush1.bf16.msra.mxu0 %v1798_v0  ;;  %983 = vmatprep.subr.bf16.mxu1 %v1779_v58 }
  0xe3   :  { %884 = vmatmul.mubr.msk.f32.vlgmr.msra.gmra.mrb[0].mxu0 %vm23_vm1, %v1138_v60  ;;  %985 = vmatpush1.bf16.msra.mxu1 %v1801_v5 }
  0xe4   :  { %885 = vmatprep.mubr.msk.f32.mxu0 %vm57_vm0, %v1571_v39 }
  0xe6   :  { %483 = vmatmul.mubr.f32.vlgmr.msra.gmra.mrb[0].mxu1 %v1556_v50 }
  0xe7   :  { %886 = vmatmul.mubr.msk.f32.gmra.mrb[2].mxu0 %vm25_vm3, %v1138_v60  ;;  %489 = vmatprep.mubr.f32.mxu1 %v1579_v7 }
  0xea   :  { %492 = vmatmul.mubr.f32.gmra.mrb[2].mxu1 %v1576_v56 }
 0x1b6   :  { %v841_v58 = vpop.f32.mrb[0].mxu0 }
 0x1b7   :  { %v843_v6 = vpop.f32.mrb[1].mxu0 }
 0x1b9   :  { %v484_v8 = vpop.f32.mrb[0].mxu1 }
 0x1ba   :  { %v1085_v16 = vadd.f32 %v841_v58, %v484_v8  ;;  %v848_v23 = vpop.f32.mrb[2].mxu0  ;;  %v486_v25 = vpop.f32.mrb[1].mxu1 }
 0x1bb   :  { %v850_v13 = vpop.f32.mrb[3].mxu0 }
 0x1bc   :  { %853 = vst.msk [vmem:[#allocation2] sm:$0xff] %vm852_vm5, %v1085_v16 }
 0x1bd   :  { %v493_v26 = vpop.f32.mrb[2].mxu1 }
 0x1be   :  { %v1086_v38 = vadd.f32 %v848_v23, %v493_v26  ;;  %v495_v11 = vpop.f32.mrb[3].mxu1 }
 0x1c0   :  { %854 = vst.msk [vmem:[#allocation2 + $0x8] sm:$0xff] %vm852_vm5, %v1086_v38 }
 0x1c1   :  { %1122 = shalt.err (!%p1119_p4)
}
 0x1c2   :  { %s1123_s3 = scalar_lea.hbm %s1742_s2, 256 }
 0x1c3   :  { %p1124_p5 = scmp.ne.s32.totalorder %s1742_s2, %s1123_s3  ;;  %p1127_p6 = scmp.lt.u32.totalorder %s1123_s3, %s1742_s2 }
 0x1c5   :  { %p1129_p7 = pnand %p1127_p6, %p1124_p5 }
 0x1c7   :  { %1132 = shalt.err (!%p1129_p7)
}
 0x1c8   :  { %s1140_s8 = smov 128   ;;  %s1141_s9 = smov 8  }
 0x1c9   :  { %866 = dma.vmem_to_hbm [thread:$0]  %s861_s28, 256, %s1742_s2, [#allocation3], %s1140_s8, %s1140_s8, %s1141_s9  }
 0x1ca   :  { %1133 = dma.done.wait [#allocation3], 256  }
 0x1cb   :  { %1134 = vsyncadd [#allocation3], 4294967040 }
 0x1cc   :  { %870 = vsyncpa [#allocation3], 1 }

</bundles_post_ra>
